<compile_context>
chip_gen: v5e
topology: v5e:2x2
jax: 0.10.0
libtpu: 0.0.40
codegen_flags: <defaults>
</compile_context>

<pallas_src>
import functools

import jax
import jax.numpy as jnp
from jax.experimental import pallas as pl
from jax.experimental.pallas import tpu as pltpu


def _sharpe_rows_kernel(returns_ref, loss_ref, *, risk_free_rate, epsilon):
    """Per-row -sharpe for one (block_b, T) tile. Fully grid-parallel."""
    x = returns_ref[...].astype(jnp.float32)              # (block_b, T)
    T = x.shape[-1]

    # One pass over x: sum and sum-of-squares (cross-lane reduces on the XLU).
    s = jnp.sum(x, axis=-1, keepdims=True)                 # (block_b, 1)
    sq = jnp.sum(x * x, axis=-1, keepdims=True)            # (block_b, 1)

    mean = s * (1.0 / T)
    # Unbiased variance: (sumsq - T*mean^2) / (T-1); clamp tiny negative from
    # cancellation so sqrt never sees a negative.
    var = jnp.maximum(sq - s * mean, 0.0) * (1.0 / (T - 1))
    std = jnp.sqrt(var) + epsilon

    loss_ref[...] = -(mean - risk_free_rate) / std


def sharpe_ratio_loss(returns, risk_free_rate=0.0, epsilon=1e-8,
                      reduction="mean", block_rows=None):
    """returns: [B, T] float32/bfloat16. Mirrors SharpeRatioLoss.forward."""
    B, T = returns.shape
    if T < 2:
        # torch.std(ddof=1) on a single sample is NaN; require T >= 2 here.
        raise ValueError("SharpeRatioLoss requires time_steps >= 2.")

    itemsize = jnp.dtype(returns.dtype).itemsize
    sublane = 16 if itemsize < 4 else 8            # packed sublanes for bf16
    lane_T = ((T + 127) // 128) * 128              # lane-padded row width in VMEM
    in_row_bytes = lane_T * itemsize               # per row, one input buffer
    out_row_bytes = 128 * 4                        # (block_b,1) f32 pads to 128 lanes
    # ~12 MiB of double-buffered tiles in flight: inside v5e's 16 MiB default
    # scoped VMEM, comfortably inside v6e/v7x, and big enough per step to
    # amortize the ~0.35 us grid-step overhead (near HBM roofline).
    budget = 12 * 1024 * 1024
    derived = budget // (2 * in_row_bytes + 2 * out_row_bytes)
    block_b = derived if block_rows is None else int(block_rows)
    block_b = max(block_b, sublane)
    if B <= block_b:
        block_b = B                                # single block: full dim is legal
    else:
        block_b = max(sublane, (block_b // sublane) * sublane)

    num_blocks = pl.cdiv(B, block_b)
    padded_B = num_blocks * block_b

    kernel = functools.partial(
        _sharpe_rows_kernel,
        risk_free_rate=float(risk_free_rate),
        epsilon=float(epsilon),
    )

    per_row = pl.pallas_call(
        kernel,
        out_shape=jax.ShapeDtypeStruct((padded_B, 1), jnp.float32),
        grid=(num_blocks,),
        in_specs=[pl.BlockSpec((block_b, T), lambda i: (i, 0))],
        out_specs=pl.BlockSpec((block_b, 1), lambda i: (i, 0)),
        compiler_params=pltpu.CompilerParams(
            dimension_semantics=("parallel",),       # independent blocks
            vmem_limit_bytes=32 * 1024 * 1024,
        ),
        cost_estimate=pl.CostEstimate(
            flops=3 * B * T + 4 * B,
            transcendentals=B,                       # one sqrt per row
            bytes_accessed=B * T * itemsize + padded_B * 4,
        ),
    )(returns)

    loss = per_row[:B, 0]                            # drop padded last-tile rows
    if reduction == "mean":
        return jnp.mean(loss)
    elif reduction == "sum":
        return jnp.sum(loss)
    elif reduction == "none":
        return loss
    raise ValueError(f"Unknown reduction: {reduction}")


def sharpe_ratio_loss_ref(returns, risk_free_rate=0.0, epsilon=1e-8):
    """Pure-JAX reference mirroring the PyTorch module (torch.std is ddof=1)."""
    r = returns.astype(jnp.float32)
    mean_return = r.mean(axis=1)
    std_return = r.std(axis=1, ddof=1) + epsilon
    sharpe = (mean_return - risk_free_rate) / std_return
    return jnp.mean(-sharpe)


if __name__ == "__main__":
    key = jax.random.PRNGKey(0)
    k1, k2, k3 = jax.random.split(key, 3)

    # Primary small example implied by the module: returns [batch=8, time=16].
    B, T = 8, 16
    returns = 0.01 * jax.random.normal(k1, (B, T), dtype=jnp.float32)
    out = jax.block_until_ready(sharpe_ratio_loss(returns))
    ref = sharpe_ratio_loss_ref(returns)
    assert jnp.allclose(out, ref, rtol=1e-4, atol=1e-6), (out, ref)

    # Multi-block grid + padded last tile (B not a multiple of block_rows).
    B2, T2 = 20, 64
    returns2 = 0.02 * jax.random.normal(k2, (B2, T2), dtype=jnp.float32) + 0.001
    out2 = jax.block_until_ready(
        sharpe_ratio_loss(returns2, risk_free_rate=5e-4, block_rows=8))
    ref2 = sharpe_ratio_loss_ref(returns2, risk_free_rate=5e-4)
    assert jnp.allclose(out2, ref2, rtol=1e-4, atol=1e-6), (out2, ref2)

    # bf16 streaming path (halves HBM bytes; kernel upcasts once to f32).
    B3, T3 = 16, 128
    returns3 = (0.01 * jax.random.normal(k3, (B3, T3), dtype=jnp.float32)
                ).astype(jnp.bfloat16)
    out3 = jax.block_until_ready(sharpe_ratio_loss(returns3))
    ref3 = sharpe_ratio_loss_ref(returns3)
    assert jnp.allclose(out3, ref3, rtol=1e-4, atol=1e-5), (out3, ref3)

    print("KERNEL_OK")
</pallas_src>

<mosaic_0001>
module attributes {stable_mosaic.version = 11 : i64} {
  func.func @_sharpe_rows_kernel(%arg0: i32, %arg1: memref<8x16xf32, #tpu.memory_space<vmem>>, %arg2: memref<8x1xf32, #tpu.memory_space<vmem>>) attributes {dimension_semantics = [#tpu.dimension_semantics<parallel>], iteration_bounds = array<i64: 1>, scalar_prefetch = 0 : i64, scratch_operands = 0 : i64, tpu.core_type = #tpu.core_type<tc>, window_params = [{transform_indices = @transform_0, window_bounds = array<i64: 8, 16>}, {transform_indices = @transform_1, window_bounds = array<i64: 8, 1>}]} {
    %c0 = arith.constant 0 : index
    %c0_0 = arith.constant 0 : index
    %0 = vector.load %arg1[%c0, %c0_0] : memref<8x16xf32, #tpu.memory_space<vmem>>, vector<8x16xf32>
    %cst = arith.constant dense<0.000000e+00> : vector<8xf32>
    %1 = vector.multi_reduction <add>, %0, %cst [1] : vector<8x16xf32> to vector<8xf32>
    %2 = vector.shape_cast %1 : vector<8xf32> to vector<8x1xf32>
    %3 = arith.mulf %0, %0 : vector<8x16xf32>
    %cst_1 = arith.constant dense<0.000000e+00> : vector<8xf32>
    %4 = vector.multi_reduction <add>, %3, %cst_1 [1] : vector<8x16xf32> to vector<8xf32>
    %5 = vector.shape_cast %4 : vector<8xf32> to vector<8x1xf32>
    %cst_2 = arith.constant 6.250000e-02 : f32
    %6 = vector.broadcast %cst_2 : f32 to vector<8x1xf32>
    %7 = arith.mulf %2, %6 : vector<8x1xf32>
    %8 = arith.mulf %2, %7 : vector<8x1xf32>
    %9 = arith.subf %5, %8 : vector<8x1xf32>
    %cst_3 = arith.constant 0.000000e+00 : f32
    %10 = vector.broadcast %cst_3 : f32 to vector<8x1xf32>
    %11 = arith.maximumf %9, %10 : vector<8x1xf32>
    %cst_4 = arith.constant 0.0666666701 : f32
    %12 = vector.broadcast %cst_4 : f32 to vector<8x1xf32>
    %13 = arith.mulf %11, %12 : vector<8x1xf32>
    %14 = math.sqrt %13 : vector<8x1xf32>
    %cst_5 = arith.constant 9.99999993E-9 : f32
    %15 = vector.broadcast %cst_5 : f32 to vector<8x1xf32>
    %16 = arith.addf %14, %15 : vector<8x1xf32>
    %cst_6 = arith.constant 0.000000e+00 : f32
    %17 = vector.broadcast %cst_6 : f32 to vector<8x1xf32>
    %18 = arith.subf %7, %17 : vector<8x1xf32>
    %cst_7 = arith.constant 0.000000e+00 : f32
    %19 = vector.broadcast %cst_7 : f32 to vector<8x1xf32>
    %20 = arith.subf %19, %18 : vector<8x1xf32>
    %21 = arith.divf %20, %16 : vector<8x1xf32>
    %c0_8 = arith.constant 0 : index
    %c0_9 = arith.constant 0 : index
    %22 = vector.load %arg2[%c0_8, %c0_9] : memref<8x1xf32, #tpu.memory_space<vmem>>, vector<8x1xf32>
    tpu.vector_store %arg2[%c0_8, %c0_9], %21 {strides = array<i32>} : memref<8x1xf32, #tpu.memory_space<vmem>>, vector<8x1xf32>,
    return
  }
  func.func @transform_0(%arg0: i32) -> (i32, i32) {
    %c0_i32 = arith.constant 0 : i32
    %c0_i32_0 = arith.constant 0 : i32
    return %arg0, %c0_i32 : i32, i32
  }
  func.func @transform_1(%arg0: i32) -> (i32, i32) {
    %c0_i32 = arith.constant 0 : i32
    %c0_i32_0 = arith.constant 0 : i32
    return %arg0, %c0_i32 : i32, i32
  }
}

</mosaic_0001>

<bundles_post_ra>
// kernel: tpu_custom_call.1
= control target key start
LH: loop header
LB: loop body
LE: loop exit
PB: predicated region body
PF: predicated region fallthrough
CT: control target
= control target key end

     0   :  { %6 = vsyncpa [#allocation3], 0  ;;  %s103_s9 = smov [#allocation2]   ;;  %s120_s0 = inlined_call_operand.hbm [shape: f32[8,16], index: 0, kind: input, shape index: {}]   ;;  %s121_s1 = inlined_call_operand.vmem [shape: f32[8,1], index: 1, kind: output, shape index: {}]  }
   0x1   :  { %s12_s8 = sshll.u32 %s120_s0, 4  ;;  %s14_s10 = sshll.u32 %s103_s9, 4  ;;  %s13_s8 = int_to_ptr.hbm [resolvable:$true] %s12_s8  ;;  %s15_s10 = int_to_ptr.vmem [resolvable:$true] %s14_s10 }
   0x2   :  { %17 = dma.hbm_to_vmem [thread:$0]  %s13_s8, 128, %s15_s10, [#allocation3]  }
   0x3   :  { %101 = dma.done.wait [#allocation3], 128  }
   0x4   :  { %102 = vsyncadd [#allocation3], 4294967168  ;;  %vm23_vm0 = vcmask 130048   ;;  %v22_v0 = vld [vmem:[#allocation2] sm:$0xff]  ;;  %vm65_vm7 = vcmask 7168  }
   0x5   :  { %v24_v1 = vsel %vm23_vm0, %v22_v0, 0.0  ;;  %v27_v2 = vmul.f32 %v22_v0, %v22_v0 }
   0x6   :  { %25 = vadd.xlane.f32.xlu0 %v24_v1 }
   0x7   :  { %v28_v3 = vsel %vm23_vm0, %v27_v2, 0.0 }
   0xe   :  { %29 = vadd.xlane.f32.xlu0 %v28_v3 }
  0x79   :  { %v26_v4 = vpop.xlane.xlu0 %25 }
  0x7a   :  { %v31_v5 = vmul.f32 0.0625, %v26_v4 }
  0x7c   :  { %v32_v6 = vmul.f32 %v31_v5, %v26_v4  ;;  %v49_v30 = vsub.f32 0.0, %v31_v5 }
  0x81   :  { %v30_v7 = vpop.xlane.xlu0 %29 }
  0x82   :  { %v33_v8 = vsub.f32 %v30_v7, %v32_v6 }
  0x84   :  { %v34_v9 = vmax.f32 %v33_v8, 0.0 }
  0x86   :  { %v35_v10 = vmul.f32 0.06666667, %v34_v9 }
  0x88   :  { %73 = vrsqrt.f32 %v35_v10  ;;  %vm43_vm1 = vcmp.eq.f32.partialorder %v35_v10, inf  ;;  %v46_v18 = vand.u32 2147483648, %v35_v10  ;;  %vm45_vm2 = vcmp.eq.f32.partialorder %v35_v10, 0.0 }
  0x8e   :  { %v74_v11 = vpop.eup %73 }
  0x8f   :  { %v37_v12 = vmul.f32 %v74_v11, %v35_v10 }
  0x91   :  { %v38_v13 = vmul.f32 %v74_v11, %v37_v12 }
  0x93   :  { %v39_v14 = vmul.f32 0.5, %v38_v13 }
  0x95   :  { %v40_v15 = vsub.f32 1.5, %v39_v14 }
  0x97   :  { %v41_v16 = vmul.f32 %v74_v11, %v40_v15 }
  0x99   :  { %v42_v17 = vmul.f32 %v41_v16, %v35_v10 }
  0x9b   :  { %v44_v19 = vsel %vm43_vm1, %v35_v10, %v42_v17 }
  0x9c   :  { %v47_v20 = vsel %vm45_vm2, %v46_v18, %v44_v19 }
  0x9d   :  { %v48_v21 = vadd.f32 1e-08, %v47_v20 }
  0x9f   :  { %75 = vrcp.f32 %v48_v21  ;;  %v61_v25 = vand.u32 2147483648, %v48_v21  ;;  %v59_v27 = vand.u32 2147483647, %v48_v21  ;;  %vm55_vm4 = vweird.f32 %v48_v21 }
  0xa1   :  { %v62_v29 = vor.u32 1.1754944e-38, %v61_v25  ;;  %vm60_vm6 = vcmp.eq.f32.partialorder %v59_v27, 8.507059e+37 }
  0xa5   :  { %v76_v22 = vpop.eup %75 }
  0xa6   :  { %v51_v23 = vmul.f32 %v76_v22, %v48_v21  ;;  %vm56_vm3 = vweird.f32 %v76_v22 }
  0xa7   :  { %vm57_vm5 = vmor %vm55_vm4, %vm56_vm3 }
  0xa8   :  { %v52_v24 = vsub.f32 1.0, %v51_v23 }
  0xaa   :  { %v53_v26 = vmul.f32 %v76_v22, %v52_v24 }
  0xac   :  { %v54_v28 = vadd.f32 %v76_v22, %v53_v26 }
  0xae   :  { %v58_v31 = vsel %vm57_vm5, %v76_v22, %v54_v28 }
  0xaf   :  { %v63_v32 = vsel %vm60_vm6, %v62_v29, %v58_v31 }
  0xb0   :  { %v64_v33 = vmul.f32 %v63_v32, %v49_v30 }
  0xb2   :  { %66 = vst.msk [vmem:[%s121_s1] sm:$0xff] %vm65_vm7, %v64_v33 }
  0xb3   :  { %71 = vsyncpa [#allocation3], 1 }

</bundles_post_ra>
